<compile_context>
chip_gen: v7x
topology: tpu7x:2x2x1
jax: 0.10.0
libtpu: 0.0.40
codegen_flags: <defaults>
</compile_context>

<pallas_src>
import math
import jax
import jax.numpy as jnp
from jax import lax
from jax.experimental import pallas as pl
from jax.experimental.pallas import tpu as pltpu

_INV_SQRT2 = 1.0 / math.sqrt(2.0)


def _projector_kernel(x_ref, w1_ref, b1_ref, w2_ref, b2_ref, o_ref):
    # x_ref:  (TM, K)  bf16    w1_ref: (K, D) bf16   b1_ref: (1, D) f32
    # w2_ref: (D, D)   bf16    b2_ref: (1, D) f32    o_ref:  (TM, D)
    # Linear 1 (MXU, bf16 in / f32 acc) + bias (f32)
    h = jnp.dot(x_ref[...], w1_ref[...], preferred_element_type=jnp.float32)
    h = h + b1_ref[...]

    # Exact GELU: 0.5 * x * (1 + erf(x / sqrt(2)))  -- EUP transcendental, f32
    h = 0.5 * h * (1.0 + lax.erf(h * _INV_SQRT2))

    # Linear 2 (MXU) + bias
    y = jnp.dot(h.astype(w2_ref.dtype), w2_ref[...],
                preferred_element_type=jnp.float32)
    y = y + b2_ref[...]

    o_ref[...] = y.astype(o_ref.dtype)


def _round_up(a, b):
    return (a + b - 1) // b * b


def str_multimodal_projector(image_features, w1, b1, w2, b2, *,
                             tm=256, compute_dtype=jnp.bfloat16):
    """image_features: (B, S, K); w1: (K, D); b1: (D,); w2: (D, D); b2: (D,)."""
    B, S, K = image_features.shape
    D = w1.shape[1]
    M = B * S

    # Row tile: as large as possible (MXU fill), capped at (padded) M for tiny
    # inputs, and split so the grid has >= 2 parallel steps when there is
    # enough work so both v7x TensorCores are used.
    tm_eff = min(tm, _round_up(M, 8))
    if M > 128 and pl.cdiv(M, tm_eff) < 2:
        tm_eff = _round_up(pl.cdiv(M, 2), 8)
    M_pad = _round_up(M, tm_eff)
    grid_m = M_pad // tm_eff

    x2d = image_features.reshape(M, K)
    if M_pad != M:
        x2d = jnp.pad(x2d, ((0, M_pad - M), (0, 0)))

    # bf16 operands for the MXU; biases stay f32 (added to the f32 accumulator).
    x2d = x2d.astype(compute_dtype)
    w1c = w1.astype(compute_dtype)
    w2c = w2.astype(compute_dtype)
    b1_2d = b1.reshape(1, D).astype(jnp.float32)
    b2_2d = b2.reshape(1, D).astype(jnp.float32)

    out_dtype = image_features.dtype
    out_itemsize = jnp.dtype(out_dtype).itemsize

    cost = pl.CostEstimate(
        flops=2 * M_pad * (K * D + D * D),
        transcendentals=M_pad * D,
        bytes_accessed=(x2d.size * x2d.dtype.itemsize
                        + w1c.size * w1c.dtype.itemsize
                        + w2c.size * w2c.dtype.itemsize
                        + (b1_2d.size + b2_2d.size) * 4
                        + M_pad * D * out_itemsize),
    )

    # TODO(synk): for very large d_embed (e.g. 4096) on v7x, tile W2/output over
    # an extra N grid axis (and/or raise vmem_limit_bytes) so the resident
    # weight blocks fit the 64 MiB VMEM; unnecessary for moderate d_embed.
    out = pl.pallas_call(
        _projector_kernel,
        out_shape=jax.ShapeDtypeStruct((M_pad, D), out_dtype),
        grid_spec=pltpu.PrefetchScalarGridSpec(
            num_scalar_prefetch=0,
            grid=(grid_m,),
            in_specs=[
                pl.BlockSpec((tm_eff, K), lambda i: (i, 0)),   # x rows
                pl.BlockSpec((K, D), lambda i: (0, 0)),        # W1 (resident)
                pl.BlockSpec((1, D), lambda i: (0, 0)),        # b1
                pl.BlockSpec((D, D), lambda i: (0, 0)),        # W2 (resident)
                pl.BlockSpec((1, D), lambda i: (0, 0)),        # b2
            ],
            out_specs=pl.BlockSpec((tm_eff, D), lambda i: (i, 0)),
        ),
        compiler_params=pltpu.CompilerParams(
            dimension_semantics=("parallel",)),
        cost_estimate=cost,
    )(x2d, w1c, b1_2d, w2c, b2_2d)

    if M_pad != M:
        out = out[:M]
    return out.reshape(B, S, D)


def _reference(image_features, w1, b1, w2, b2):
    h = image_features @ w1 + b1
    h = 0.5 * h * (1.0 + lax.erf(h / math.sqrt(2.0)))
    return h @ w2 + b2


if __name__ == "__main__":
    # Shapes implied by the module: (..., vision_hidden_size=768) -> d_embed.
    K = 768                  # vision_hidden_size (fixed in the module)
    D = 256                  # config['d_embed'] (kept small / lane-aligned)

    key = jax.random.PRNGKey(0)
    k_x, k_w1, k_b1, k_w2, k_b2, k_x2 = jax.random.split(key, 6)

    # nn.Linear weights are (out, in); store pre-transposed (in, out).
    w1 = jax.random.normal(k_w1, (K, D), dtype=jnp.float32) * (1.0 / math.sqrt(K))
    b1 = jax.random.normal(k_b1, (D,), dtype=jnp.float32) * 0.01
    w2 = jax.random.normal(k_w2, (D, D), dtype=jnp.float32) * (1.0 / math.sqrt(D))
    b2 = jax.random.normal(k_b2, (D,), dtype=jnp.float32) * 0.01

    # Case 1: tiny input (single small tile).
    B, S = 2, 8
    x = jax.random.normal(k_x, (B, S, K), dtype=jnp.float32)
    y = jax.block_until_ready(str_multimodal_projector(x, w1, b1, w2, b2))
    y_ref = _reference(x, w1, b1, w2, b2)
    assert y.shape == (B, S, D)
    # bf16 MXU operands with f32 accumulation -> tolerance wider than pure f32.
    assert jnp.allclose(y, y_ref, atol=5e-2, rtol=5e-2), \
        f"max abs err {jnp.max(jnp.abs(y - y_ref))}"

    # Case 2: ragged M (exercises padding + multi-step parallel grid).
    B2, S2 = 3, 100
    x2 = jax.random.normal(k_x2, (B2, S2, K), dtype=jnp.float32)
    y2 = jax.block_until_ready(str_multimodal_projector(x2, w1, b1, w2, b2))
    y2_ref = _reference(x2, w1, b1, w2, b2)
    assert y2.shape == (B2, S2, D)
    assert jnp.allclose(y2, y2_ref, atol=5e-2, rtol=5e-2), \
        f"max abs err {jnp.max(jnp.abs(y2 - y2_ref))}"

    print("KERNEL_OK")
</pallas_src>

<mosaic_0001>
module attributes {stable_mosaic.version = 11 : i64} {
  func.func @_projector_kernel(%arg0: i32, %arg1: memref<16x768xbf16, #tpu.memory_space<vmem>>, %arg2: memref<768x256xbf16, #tpu.memory_space<vmem>>, %arg3: memref<1x256xf32, #tpu.memory_space<vmem>>, %arg4: memref<256x256xbf16, #tpu.memory_space<vmem>>, %arg5: memref<1x256xf32, #tpu.memory_space<vmem>>, %arg6: memref<16x256xf32, #tpu.memory_space<vmem>>) attributes {dimension_semantics = [#tpu.dimension_semantics<parallel>], iteration_bounds = array<i64: 1>, scalar_prefetch = 0 : i64, scratch_operands = 0 : i64, tpu.core_type = #tpu.core_type<tc>, window_params = [{transform_indices = @transform_0, window_bounds = array<i64: 16, 768>}, {pipeline_mode = #tpu.pipeline_mode<synchronous>, transform_indices = @transform_1, window_bounds = array<i64: 768, 256>}, {pipeline_mode = #tpu.pipeline_mode<synchronous>, transform_indices = @transform_2, window_bounds = array<i64: 1, 256>}, {pipeline_mode = #tpu.pipeline_mode<synchronous>, transform_indices = @transform_3, window_bounds = array<i64: 256, 256>}, {pipeline_mode = #tpu.pipeline_mode<synchronous>, transform_indices = @transform_4, window_bounds = array<i64: 1, 256>}, {transform_indices = @transform_5, window_bounds = array<i64: 16, 256>}]} {
    %c0 = arith.constant 0 : index
    %c0_0 = arith.constant 0 : index
    %0 = vector.load %arg1[%c0, %c0_0] : memref<16x768xbf16, #tpu.memory_space<vmem>>, vector<16x768xbf16>
    %c0_1 = arith.constant 0 : index
    %c0_2 = arith.constant 0 : index
    %1 = vector.load %arg2[%c0_1, %c0_2] : memref<768x256xbf16, #tpu.memory_space<vmem>>, vector<768x256xbf16>
    %cst = arith.constant dense<0.000000e+00> : vector<16x256xf32>
    %2 = tpu.matmul %0, %1, %cst {dimension_numbers = #tpu.dot_dimension_numbers<[1], [0], [0], [1], [0, 0, 1, 1], [], []>} : vector<16x768xbf16>, vector<768x256xbf16>, vector<16x256xf32> -> vector<16x256xf32>
    %c0_3 = arith.constant 0 : index
    %c0_4 = arith.constant 0 : index
    %3 = vector.load %arg3[%c0_3, %c0_4] : memref<1x256xf32, #tpu.memory_space<vmem>>, vector<1x256xf32>
    %4 = vector.broadcast %3 : vector<1x256xf32> to vector<16x256xf32>
    %5 = arith.addf %2, %4 : vector<16x256xf32>
    %cst_5 = arith.constant 5.000000e-01 : f32
    %6 = vector.broadcast %cst_5 : f32 to vector<16x256xf32>
    %7 = arith.mulf %6, %5 : vector<16x256xf32>
    %cst_6 = arith.constant 0.707106769 : f32
    %8 = vector.broadcast %cst_6 : f32 to vector<16x256xf32>
    %9 = arith.mulf %5, %8 : vector<16x256xf32>
    %10 = math.erf %9 : vector<16x256xf32>
    %cst_7 = arith.constant 1.000000e+00 : f32
    %11 = vector.broadcast %cst_7 : f32 to vector<16x256xf32>
    %12 = arith.addf %11, %10 : vector<16x256xf32>
    %13 = arith.mulf %7, %12 : vector<16x256xf32>
    %14 = arith.truncf %13 : vector<16x256xf32> to vector<16x256xbf16>
    %c0_8 = arith.constant 0 : index
    %c0_9 = arith.constant 0 : index
    %15 = vector.load %arg4[%c0_8, %c0_9] : memref<256x256xbf16, #tpu.memory_space<vmem>>, vector<256x256xbf16>
    %cst_10 = arith.constant dense<0.000000e+00> : vector<16x256xf32>
    %16 = tpu.matmul %14, %15, %cst_10 {dimension_numbers = #tpu.dot_dimension_numbers<[1], [0], [0], [1], [0, 0, 1, 1], [], []>} : vector<16x256xbf16>, vector<256x256xbf16>, vector<16x256xf32> -> vector<16x256xf32>
    %c0_11 = arith.constant 0 : index
    %c0_12 = arith.constant 0 : index
    %17 = vector.load %arg5[%c0_11, %c0_12] : memref<1x256xf32, #tpu.memory_space<vmem>>, vector<1x256xf32>
    %18 = vector.broadcast %17 : vector<1x256xf32> to vector<16x256xf32>
    %19 = arith.addf %16, %18 : vector<16x256xf32>
    %c0_13 = arith.constant 0 : index
    %c0_14 = arith.constant 0 : index
    %20 = vector.load %arg6[%c0_13, %c0_14] : memref<16x256xf32, #tpu.memory_space<vmem>>, vector<16x256xf32>
    tpu.vector_store %arg6[%c0_13, %c0_14], %19 {strides = array<i32>} : memref<16x256xf32, #tpu.memory_space<vmem>>, vector<16x256xf32>,
    return
  }
  func.func @transform_0(%arg0: i32) -> (i32, i32) {
    %c0_i32 = arith.constant 0 : i32
    %c0_i32_0 = arith.constant 0 : i32
    return %arg0, %c0_i32 : i32, i32
  }
  func.func @transform_1(%arg0: i32) -> (i32, i32) {
    %c0_i32 = arith.constant 0 : i32
    %c0_i32_0 = arith.constant 0 : i32
    %c0_i32_1 = arith.constant 0 : i32
    return %c0_i32, %c0_i32_0 : i32, i32
  }
  func.func @transform_2(%arg0: i32) -> (i32, i32) {
    %c0_i32 = arith.constant 0 : i32
    %c0_i32_0 = arith.constant 0 : i32
    %c0_i32_1 = arith.constant 0 : i32
    return %c0_i32, %c0_i32_0 : i32, i32
  }
  func.func @transform_3(%arg0: i32) -> (i32, i32) {
    %c0_i32 = arith.constant 0 : i32
    %c0_i32_0 = arith.constant 0 : i32
    %c0_i32_1 = arith.constant 0 : i32
    return %c0_i32, %c0_i32_0 : i32, i32
  }
  func.func @transform_4(%arg0: i32) -> (i32, i32) {
    %c0_i32 = arith.constant 0 : i32
    %c0_i32_0 = arith.constant 0 : i32
    %c0_i32_1 = arith.constant 0 : i32
    return %c0_i32, %c0_i32_0 : i32, i32
  }
  func.func @transform_5(%arg0: i32) -> (i32, i32) {
    %c0_i32 = arith.constant 0 : i32
    %c0_i32_0 = arith.constant 0 : i32
    return %arg0, %c0_i32 : i32, i32
  }
}

</mosaic_0001>

<bundles_post_ra>
// kernel: tpu_custom_call.1
= control target key start
LH: loop header
LB: loop body
LE: loop exit
PB: predicated region body
PF: predicated region fallthrough
CT: control target
= control target key end

     0   :  { %10 = vsyncpa [#allocation3], 0  ;;  %s1665_s0 = inlined_call_operand.hbm [shape: bf16[16,768], index: 0, kind: input, shape index: {}]   ;;  %s1666_s1 = inlined_call_operand.hbm [shape: bf16[768,256], index: 1, kind: input, shape index: {}]   ;;  %s1667_s2 = inlined_call_operand.vmem [shape: f32[1,256], index: 2, kind: input, shape index: {}]   ;;  %s1668_s3 = inlined_call_operand.hbm [shape: bf16[256,256], index: 3, kind: input, shape index: {}]   ;;  %s1669_s4 = inlined_call_operand.vmem [shape: f32[1,256], index: 4, kind: input, shape index: {}]   ;;  %s1670_s5 = inlined_call_operand.hbm [shape: f32[16,256], index: 5, kind: output, shape index: {}]  }
   0x1   :  { %11 = vsyncpa [#allocation6], 0 }
   0x2   :  { %12 = vsyncpa [#allocation4], 0  ;;  %s1565_s18 = smov [#allocation5]   ;;  %s1471_s22 = scalar_lea.hbm %s1666_s1, 12288 }
   0x3   :  { %s30_s19 = sshll.u32 %s1565_s18, 4  ;;  %p1472_p0 = scmp.ne.s32.totalorder %s1666_s1, %s1471_s22  ;;  %s31_s19 = int_to_ptr.vmem [resolvable:$true] %s30_s19 }
   0x4   :  { %p1475_p1 = scmp.lt.u32.totalorder %s1471_s22, %s1666_s1 }
   0x6   :  { %p1477_p2 = pnand %p1475_p1, %p1472_p0 }
   0x8   :  { %1480 = shalt.err (!%p1477_p2)
}
   0x9   :  { %s1481_s27 = scalar_lea.vmem %s31_s19, 12288  ;;  %p1486_p4 = scmp.lt.s32.totalorder %s31_s19, %s31_s19 }
   0xa   :  { %p1482_p3 = scmp.ne.s32.totalorder %s31_s19, %s1481_s27  ;;  %p1487_p5 = scmp.lt.s32.totalorder %s1481_s27, %s1481_s27 }
   0xc   :  { %p1488_p6 = por %p1487_p5, %p1486_p4 }
   0xe   :  { %p1489_p7 = pnand %p1488_p6, %p1482_p3 }
  0x10   :  { %1492 = shalt.err (!%p1489_p7)
}
  0x11   :  { %s1566_s28 = smov 128   ;;  %s1567_s29 = smov 8  }
  0x12   :  { %36 = dma.hbm_to_vmem [thread:$0]  %s1666_s1, 12288, %s31_s19, [#allocation6], %s1566_s28, %s1566_s28, %s1567_s29  }
  0x13   :  { %s1568_s7 = smov [#allocation2]   ;;  %s1493_s11 = scalar_lea.hbm %s1665_s0, 768 }
  0x14   :  { %s18_s8 = sshll.u32 %s1568_s7, 4  ;;  %p1494_p8 = scmp.ne.s32.totalorder %s1665_s0, %s1493_s11  ;;  %s19_s8 = int_to_ptr.vmem [resolvable:$true] %s18_s8 }
  0x15   :  { %p1497_p9 = scmp.lt.u32.totalorder %s1493_s11, %s1665_s0 }
  0x17   :  { %p1499_p10 = pnand %p1497_p9, %p1494_p8 }
  0x19   :  { %1502 = shalt.err (!%p1499_p10)
}
  0x1a   :  { %s1503_s16 = scalar_lea.vmem %s19_s8, 768  ;;  %p1508_p12 = scmp.lt.s32.totalorder %s19_s8, %s19_s8 }
  0x1b   :  { %p1504_p11 = scmp.ne.s32.totalorder %s19_s8, %s1503_s16  ;;  %p1509_p13 = scmp.lt.s32.totalorder %s1503_s16, %s1503_s16 }
  0x1d   :  { %p1510_p0 = por %p1509_p13, %p1508_p12 }
  0x1f   :  { %p1511_p1 = pnand %p1510_p0, %p1504_p11 }
  0x21   :  { %1514 = shalt.err (!%p1511_p1)
}
  0x22   :  { %s1569_s1 = smov 384   ;;  %s1570_s17 = smov 24  }
  0x23   :  { %24 = dma.hbm_to_vmem [thread:$0]  %s1665_s0, 768, %s19_s8, [#allocation3], %s1569_s1, %s1569_s1, %s1570_s17  }
  0x24   :  { %s1571_s20 = smov [#allocation7]   ;;  %s1515_s24 = scalar_lea.hbm %s1668_s3, 4096 }
  0x25   :  { %s44_s21 = sshll.u32 %s1571_s20, 4  ;;  %p1516_p2 = scmp.ne.s32.totalorder %s1668_s3, %s1515_s24  ;;  %s45_s21 = int_to_ptr.vmem [resolvable:$true] %s44_s21 }
  0x26   :  { %p1519_p3 = scmp.lt.u32.totalorder %s1515_s24, %s1668_s3 }
  0x28   :  { %p1521_p4 = pnand %p1519_p3, %p1516_p2 }
  0x2a   :  { %1524 = shalt.err (!%p1521_p4)
}
  0x2b   :  { %s1525_s6 = scalar_lea.vmem %s45_s21, 4096  ;;  %p1530_p6 = scmp.lt.s32.totalorder %s45_s21, %s45_s21 }
  0x2c   :  { %p1526_p5 = scmp.ne.s32.totalorder %s45_s21, %s1525_s6  ;;  %p1531_p7 = scmp.lt.s32.totalorder %s1525_s6, %s1525_s6 }
  0x2e   :  { %p1532_p8 = por %p1531_p7, %p1530_p6 }
  0x30   :  { %p1533_p9 = pnand %p1532_p8, %p1526_p5 }
  0x32   :  { %1536 = shalt.err (!%p1533_p9)
}
  0x33   :  { %50 = dma.hbm_to_vmem [thread:$0]  %s1668_s3, 4096, %s45_s21, [#allocation6], %s1566_s28, %s1566_s28, %s1567_s29  }
  0x34   :  { %1559 = dma.done.wait [#allocation3], 768  }
  0x35   :  { %1560 = vsyncadd [#allocation3], 4294966528 }
  0x36   :  { %1561 = dma.done.wait [#allocation6], 16384  }
  0x37   :  { %1562 = vsyncadd [#allocation6], 4294950912  ;;  %v1262_v0 = vld [vmem:[#allocation5 + $0x104] ss:$8 sps:$4 sm:$0xff]   ;;  %v1264_v1 = vld [vmem:[#allocation5 + $0x100] ss:$8 sps:$4 sm:$0xff]  }
  0x38   :  { %729 = vmatprep.subr.bf16.mxu0 %v1262_v0  ;;  %v1265_v2 = vld [vmem:[#allocation5 + $0x114] ss:$8 sps:$4 sm:$0xff]   ;;  %v1267_v3 = vld [vmem:[#allocation5 + $0x110] ss:$8 sps:$4 sm:$0xff]   ;;  %v1268_v4 = vld [vmem:[#allocation5 + $0x124] ss:$8 sps:$4 sm:$0xff]  }
  0x39   :  { %730 = vmatpush1.bf16.msra.mxu0 %v1264_v1  ;;  %v1270_v5 = vld [vmem:[#allocation5 + $0x120] ss:$8 sps:$4 sm:$0xff]   ;;  %v1271_v6 = vld [vmem:[#allocation5 + $0x134] ss:$8 sps:$4 sm:$0xff]   ;;  %v1273_v7 = vld [vmem:[#allocation5 + $0x130] ss:$8 sps:$4 sm:$0xff]  }
  0x3a   :  { %731 = vmatprep.subr.bf16.mxu0 %v1265_v2  ;;  %v1274_v8 = vld [vmem:[#allocation5 + $0x144] ss:$8 sps:$4 sm:$0xff]   ;;  %v1276_v9 = vld [vmem:[#allocation5 + $0x140] ss:$8 sps:$4 sm:$0xff]   ;;  %v1277_v10 = vld [vmem:[#allocation5 + $0x154] ss:$8 sps:$4 sm:$0xff]  }
  0x3b   :  { %v1279_v11 = vld [vmem:[#allocation5 + $0x150] ss:$8 sps:$4 sm:$0xff]   ;;  %v1280_v12 = vld [vmem:[#allocation5 + $0x164] ss:$8 sps:$4 sm:$0xff]   ;;  %v1309_v14 = vld [vmem:[#allocation5] ss:$8 sps:$4 sm:$0xff]  }
  0x3c   :  { %v1307_v13 = vld [vmem:[#allocation5 + $0x4] ss:$8 sps:$4 sm:$0xff]   ;;  %v1282_v15 = vld [vmem:[#allocation5 + $0x160] ss:$8 sps:$4 sm:$0xff]   ;;  %v1313_v16 = vld [vmem:[#allocation5 + $0x14] ss:$8 sps:$4 sm:$0xff]  }
  0x3d   :  { %732 = vmatpush1.bf16.msra.mxu0 %v1267_v3  ;;  %686 = vmatprep.subr.bf16.mxu1 %v1307_v13  ;;  %v1315_v17 = vld [vmem:[#allocation5 + $0x10] ss:$8 sps:$4 sm:$0xff]   ;;  %v1283_v18 = vld [vmem:[#allocation5 + $0x174] ss:$8 sps:$4 sm:$0xff]   ;;  %v1322_v21 = vld [vmem:[#allocation5 + $0x24] ss:$8 sps:$4 sm:$0xff]  }
  0x3e   :  { %733 = vmatprep.subr.bf16.mxu0 %v1268_v4  ;;  %687 = vmatpush1.bf16.msra.mxu1 %v1309_v14  ;;  %v1318_v19 = vld [vmem:[#allocation2 + $0xc] ss:$24 sps:$4 sm:$0xff]   ;;  %v1285_v20 = vld [vmem:[#allocation5 + $0x170] ss:$8 sps:$4 sm:$0xff]   ;;  %v1324_v22 = vld [vmem:[#allocation5 + $0x20] ss:$8 sps:$4 sm:$0xff]  }
  0x3f   :  { %688 = vmatprep.subr.bf16.mxu1 %v1313_v16  ;;  %v1286_v23 = vld [vmem:[#allocation5 + $0x184] ss:$8 sps:$4 sm:$0xff]   ;;  %761 = vmatprep.mubr.bf16.mxu0 %v1318_v19  ;;  %v1288_v24 = vld [vmem:[#allocation5 + $0x180] ss:$8 sps:$4 sm:$0xff]   ;;  %v1328_v25 = vld [vmem:[#allocation5 + $0x34] ss:$8 sps:$4 sm:$0xff]  }
  0x40   :  { %v1289_v26 = vld [vmem:[#allocation5 + $0x194] ss:$8 sps:$4 sm:$0xff]   ;;  %v1330_v27 = vld [vmem:[#allocation5 + $0x30] ss:$8 sps:$4 sm:$0xff]   ;;  %v1334_v28 = vld [vmem:[#allocation5 + $0x44] ss:$8 sps:$4 sm:$0xff]  }
  0x41   :  { %734 = vmatpush1.bf16.msra.mxu0 %v1270_v5  ;;  %v1291_v29 = vld [vmem:[#allocation5 + $0x190] ss:$8 sps:$4 sm:$0xff]   ;;  %v1292_v30 = vld [vmem:[#allocation5 + $0x1a4] ss:$8 sps:$4 sm:$0xff]   ;;  %v1336_v31 = vld [vmem:[#allocation5 + $0x40] ss:$8 sps:$4 sm:$0xff]  }
  0x42   :  { %735 = vmatprep.subr.bf16.mxu0 %v1271_v6  ;;  %689 = vmatpush1.bf16.msra.mxu1 %v1315_v17  ;;  %v1340_v32 = vld [vmem:[#allocation5 + $0x54] ss:$8 sps:$4 sm:$0xff]   ;;  %v1294_v33 = vld [vmem:[#allocation5 + $0x1a0] ss:$8 sps:$4 sm:$0xff]   ;;  %v1342_v35 = vld [vmem:[#allocation5 + $0x50] ss:$8 sps:$4 sm:$0xff]  }
  0x43   :  { %690 = vmatprep.subr.bf16.mxu1 %v1322_v21  ;;  %v1295_v34 = vld [vmem:[#allocation5 + $0x1b4] ss:$8 sps:$4 sm:$0xff]   ;;  %v1346_v36 = vld [vmem:[#allocation5 + $0x64] ss:$8 sps:$4 sm:$0xff]   ;;  %v1297_v37 = vld [vmem:[#allocation5 + $0x1b0] ss:$8 sps:$4 sm:$0xff]  }
  0x44   :  { %v1298_v38 = vld [vmem:[#allocation5 + $0x1c4] ss:$8 sps:$4 sm:$0xff]   ;;  %v1348_v39 = vld [vmem:[#allocation5 + $0x60] ss:$8 sps:$4 sm:$0xff]   ;;  %v1352_v40 = vld [vmem:[#allocation5 + $0x74] ss:$8 sps:$4 sm:$0xff]  }
  0x45   :  { %736 = vmatpush1.bf16.msra.mxu0 %v1273_v7  ;;  %v1300_v41 = vld [vmem:[#allocation5 + $0x1c0] ss:$8 sps:$4 sm:$0xff]   ;;  %v1301_v42 = vld [vmem:[#allocation5 + $0x1d4] ss:$8 sps:$4 sm:$0xff]   ;;  %v1354_v43 = vld [vmem:[#allocation5 + $0x70] ss:$8 sps:$4 sm:$0xff]  }
  0x46   :  { %737 = vmatprep.subr.bf16.mxu0 %v1274_v8  ;;  %691 = vmatpush1.bf16.msra.mxu1 %v1324_v22  ;;  %v1358_v44 = vld [vmem:[#allocation5 + $0x84] ss:$8 sps:$4 sm:$0xff]   ;;  %v1303_v45 = vld [vmem:[#allocation5 + $0x1d0] ss:$8 sps:$4 sm:$0xff]   ;;  %v1360_v47 = vld [vmem:[#allocation5 + $0x80] ss:$8 sps:$4 sm:$0xff]  }
  0x47   :  { %692 = vmatprep.subr.bf16.mxu1 %v1328_v25  ;;  %v1304_v46 = vld [vmem:[#allocation5 + $0x1e4] ss:$8 sps:$4 sm:$0xff]   ;;  %v1364_v48 = vld [vmem:[#allocation5 + $0x94] ss:$8 sps:$4 sm:$0xff]   ;;  %v1306_v49 = vld [vmem:[#allocation5 + $0x1e0] ss:$8 sps:$4 sm:$0xff]  }
  0x48   :  { %v1310_v50 = vld [vmem:[#allocation5 + $0x1f4] ss:$8 sps:$4 sm:$0xff]   ;;  %v1366_v51 = vld [vmem:[#allocation5 + $0x90] ss:$8 sps:$4 sm:$0xff]   ;;  %v1370_v52 = vld [vmem:[#allocation5 + $0xa4] ss:$8 sps:$4 sm:$0xff]  }
  0x49   :  { %738 = vmatpush1.bf16.msra.mxu0 %v1276_v9  ;;  %v1312_v53 = vld [vmem:[#allocation5 + $0x1f0] ss:$8 sps:$4 sm:$0xff]   ;;  %v1321_v54 = vld [vmem:[#allocation5 + $0x204] ss:$8 sps:$4 sm:$0xff]   ;;  %v1372_v55 = vld [vmem:[#allocation5 + $0xa0] ss:$8 sps:$4 sm:$0xff]  }
  0x4a   :  { %739 = vmatprep.subr.bf16.mxu0 %v1277_v10  ;;  %693 = vmatpush1.bf16.msra.mxu1 %v1330_v27  ;;  %v1376_v56 = vld [vmem:[#allocation5 + $0xb4] ss:$8 sps:$4 sm:$0xff]   ;;  %v1316_v57 = vld [vmem:[#allocation2 + $0x8] ss:$24 sps:$4 sm:$0xff]   ;;  %v1319_v58 = vld [vmem:[#allocation5 + $0x200] ss:$8 sps:$4 sm:$0xff]  }
  0x4b   :  { %694 = vmatprep.subr.bf16.mxu1 %v1334_v28  ;;  %v1327_v59 = vld [vmem:[#allocation5 + $0x214] ss:$8 sps:$4 sm:$0xff]   ;;  %v1378_v60 = vld [vmem:[#allocation5 + $0xb0] ss:$8 sps:$4 sm:$0xff]   ;;  %v1382_v61 = vld [vmem:[#allocation5 + $0xc4] ss:$8 sps:$4 sm:$0xff]  }
  0x4c   :  { %v1408_v62 = vld [vmem:[#allocation2 + $0x4] ss:$24 sps:$4 sm:$0xff]   ;;  %v1325_v63 = vld [vmem:[#allocation5 + $0x210] ss:$8 sps:$4 sm:$0xff]   ;;  %v1384_v1 = vld [vmem:[#allocation5 + $0xc0] ss:$8 sps:$4 sm:$0xff]  }
  0x4d   :  { %740 = vmatpush1.bf16.msra.mxu0 %v1279_v11  ;;  %v1333_v0 = vld [vmem:[#allocation5 + $0x224] ss:$8 sps:$4 sm:$0xff]   ;;  %v1388_v3 = vld [vmem:[#allocation5 + $0xd4] ss:$8 sps:$4 sm:$0xff]   ;;  %718 = vmatprep.mubr.bf16.mxu1 %v1408_v62  ;;  %v1331_v4 = vld [vmem:[#allocation5 + $0x220] ss:$8 sps:$4 sm:$0xff]  }
  0x4e   :  { %741 = vmatprep.subr.bf16.mxu0 %v1280_v12  ;;  %695 = vmatpush1.bf16.msra.mxu1 %v1336_v31  ;;  %v1414_v2 = vld [vmem:[#allocation2 + $0x14] ss:$24 sps:$4 sm:$0xff]   ;;  %v1390_v6 = vld [vmem:[#allocation5 + $0xd0] ss:$8 sps:$4 sm:$0xff]   ;;  %v1396_v10 = vld [vmem:[#allocation5 + $0xe0] ss:$8 sps:$4 sm:$0xff]  }
  0x4f   :  { %696 = vmatprep.subr.bf16.mxu1 %v1340_v32  ;;  %v1339_v5 = vld [vmem:[#allocation5 + $0x234] ss:$8 sps:$4 sm:$0xff]   ;;  %v1394_v7 = vld [vmem:[#allocation5 + $0xe4] ss:$8 sps:$4 sm:$0xff]   ;;  %v1337_v8 = vld [vmem:[#allocation5 + $0x230] ss:$8 sps:$4 sm:$0xff]  }
  0x50   :  { %v1345_v9 = vld [vmem:[#allocation5 + $0x244] ss:$8 sps:$4 sm:$0xff]   ;;  %v1400_v11 = vld [vmem:[#allocation5 + $0xf4] ss:$8 sps:$4 sm:$0xff]   ;;  %v1343_v12 = vld [vmem:[#allocation5 + $0x240] ss:$8 sps:$4 sm:$0xff]  }
  0x51   :  { %742 = vmatpush1.bf16.msra.mxu0 %v1282_v15  ;;  %v1351_v13 = vld [vmem:[#allocation5 + $0x254] ss:$8 sps:$4 sm:$0xff]   ;;  %v1402_v14 = vld [vmem:[#allocation5 + $0xf0] ss:$8 sps:$4 sm:$0xff]   ;;  %v1417_v16 = vld [vmem:[#allocation7 + $0x4] ss:$8 sps:$4 sm:$0xff]  }
  0x52   :  { %743 = vmatprep.subr.bf16.mxu0 %v1283_v18  ;;  %697 = vmatpush1.bf16.msra.mxu1 %v1342_v35  ;;  %v1406_v15 = vld [vmem:[#allocation2] ss:$24 sps:$4 sm:$0xff]   ;;  %v1357_v19 = vld [vmem:[#allocation5 + $0x264] ss:$8 sps:$4 sm:$0xff]   ;;  %v1426_v28 = vld [vmem:[#allocation7 + $0x34] ss:$8 sps:$4 sm:$0xff]  }
  0x53   :  { %698 = vmatprep.subr.bf16.mxu1 %v1346_v36  ;;  %v1349_v17 = vld [vmem:[#allocation5 + $0x250] ss:$8 sps:$4 sm:$0xff]   ;;  %v1415_v18 = vld [vmem:[#allocation7] ss:$8 sps:$4 sm:$0xff]   ;;  %v1369_v27 = vld [vmem:[#allocation5 + $0x284] ss:$8 sps:$4 sm:$0xff]  }
  0x54   :  { %v1355_v21 = vld [vmem:[#allocation5 + $0x260] ss:$8 sps:$4 sm:$0xff]   ;;  %v1418_v22 = vld [vmem:[#allocation7 + $0x10] ss:$8 sps:$4 sm:$0xff]   ;;  %v1375_v31 = vld [vmem:[#allocation5 + $0x294] ss:$8 sps:$4 sm:$0xff]  }
  0x55   :  { %744 = vmatpush1.bf16.msra.mxu0 %v1285_v20  ;;  %v1420_v20 = vld [vmem:[#allocation7 + $0x14] ss:$8 sps:$4 sm:$0xff]   ;;  %v1361_v25 = vld [vmem:[#allocation5 + $0x270] ss:$8 sps:$4 sm:$0xff]   ;;  %v1429_v32 = vld [vmem:[#allocation7 + $0x44] ss:$8 sps:$4 sm:$0xff]  }
  0x56   :  { %745 = vmatprep.subr.bf16.mxu0 %v1286_v23  ;;  %699 = vmatpush1.bf16.msra.mxu1 %v1348_v39  ;;  %v1363_v23 = vld [vmem:[#allocation5 + $0x274] ss:$8 sps:$4 sm:$0xff]   ;;  %v1381_v35 = vld [vmem:[#allocation5 + $0x2a4] ss:$8 sps:$4 sm:$0xff]   ;;  %s1572_s8 = smov [#allocation8]  }
  0x57   :  { %700 = vmatprep.subr.bf16.mxu1 %v1352_v40  ;;  %v1432_v36 = vld [vmem:[#allocation7 + $0x54] ss:$8 sps:$4 sm:$0xff]   ;;  %v1435_v40 = vld [vmem:[#allocation7 + $0x64] ss:$8 sps:$4 sm:$0xff]   ;;  %s1093_s9 = sshll.u32 %s1572_s8, 4  ;;  %s1094_s9 = int_to_ptr.vmem [resolvable:$true] %s1093_s9 }
  0x58   :  { %v1387_v39 = vld [vmem:[#allocation5 + $0x2b4] ss:$8 sps:$4 sm:$0xff]   ;;  %v1453_v62 = vld [vmem:[#allocation7 + $0xc4] ss:$8 sps:$4 sm:$0xff]   ;;  %s1537_s10 = scalar_lea.vmem %s1094_s9, 512  ;;  %p1542_p11 = scmp.lt.s32.totalorder %s1094_s9, %s1094_s9 }
  0x59   :  { %746 = vmatpush1.bf16.msra.mxu0 %v1288_v24  ;;  %v1423_v24 = vld [vmem:[#allocation7 + $0x24] ss:$8 sps:$4 sm:$0xff]   ;;  %p1538_p10 = scmp.ne.s32.totalorder %s1094_s9, %s1537_s10  ;;  %p1543_p12 = scmp.lt.s32.totalorder %s1537_s10, %s1537_s10 }
  0x5a   :  { %747 = vmatprep.subr.bf16.mxu0 %v1289_v26  ;;  %701 = vmatpush1.bf16.msra.mxu1 %v1354_v43  ;;  %v1421_v26 = vld [vmem:[#allocation7 + $0x20] ss:$8 sps:$4 sm:$0xff]   ;;  %v1393_v43 = vld [vmem:[#allocation5 + $0x2c4] ss:$8 sps:$4 sm:$0xff]  }
  0x5b   :  { %702 = vmatprep.subr.bf16.mxu1 %v1358_v44  ;;  %v1438_v44 = vld [vmem:[#allocation7 + $0x74] ss:$8 sps:$4 sm:$0xff]   ;;  %p1544_p13 = por %p1543_p12, %p1542_p11 }
  0x5d   :  { %748 = vmatpush1.bf16.msra.mxu0 %v1291_v29  ;;  %v1367_v29 = vld [vmem:[#allocation5 + $0x280] ss:$8 sps:$4 sm:$0xff]   ;;  %p1545_p0 = pnand %p1544_p13, %p1538_p10 }
  0x5e   :  { %749 = vmatprep.subr.bf16.mxu0 %v1292_v30  ;;  %703 = vmatpush1.bf16.msra.mxu1 %v1360_v47  ;;  %v1424_v30 = vld [vmem:[#allocation7 + $0x30] ss:$8 sps:$4 sm:$0xff]   ;;  %v1399_v47 = vld [vmem:[#allocation5 + $0x2d4] ss:$8 sps:$4 sm:$0xff]  }
  0x5f   :  { %704 = vmatprep.subr.bf16.mxu1 %v1364_v48  ;;  %v1441_v48 = vld [vmem:[#allocation7 + $0x84] ss:$8 sps:$4 sm:$0xff]  }
  0x61   :  { %750 = vmatpush1.bf16.msra.mxu0 %v1294_v33  ;;  %v1373_v33 = vld [vmem:[#allocation5 + $0x290] ss:$8 sps:$4 sm:$0xff]  }
  0x62   :  { %751 = vmatprep.subr.bf16.mxu0 %v1295_v34  ;;  %705 = vmatpush1.bf16.msra.mxu1 %v1366_v51  ;;  %v1427_v34 = vld [vmem:[#allocation7 + $0x40] ss:$8 sps:$4 sm:$0xff]   ;;  %v1405_v51 = vld [vmem:[#allocation5 + $0x2e4] ss:$8 sps:$4 sm:$0xff]  }
  0x63   :  { %706 = vmatprep.subr.bf16.mxu1 %v1370_v52  ;;  %v1403_v52 = vld [vmem:[#allocation5 + $0x2e0] ss:$8 sps:$4 sm:$0xff]  }
  0x65   :  { %752 = vmatpush1.bf16.msra.mxu0 %v1297_v37  ;;  %v1379_v37 = vld [vmem:[#allocation5 + $0x2a0] ss:$8 sps:$4 sm:$0xff]  }
  0x66   :  { %753 = vmatprep.subr.bf16.mxu0 %v1298_v38  ;;  %707 = vmatpush1.bf16.msra.mxu1 %v1372_v55  ;;  %v1430_v38 = vld [vmem:[#allocation7 + $0x50] ss:$8 sps:$4 sm:$0xff]  }
  0x67   :  { %708 = vmatprep.subr.bf16.mxu1 %v1376_v56  ;;  %v1412_v55 = vld [vmem:[#allocation2 + $0x10] ss:$24 sps:$4 sm:$0xff]  }
  0x68   :  { %v1442_v56 = vld [vmem:[#allocation7 + $0x90] ss:$8 sps:$4 sm:$0xff]  }
  0x69   :  { %754 = vmatpush1.bf16.msra.mxu0 %v1300_v41  ;;  %v1385_v41 = vld [vmem:[#allocation5 + $0x2b0] ss:$8 sps:$4 sm:$0xff]  }
  0x6a   :  { %755 = vmatprep.subr.bf16.mxu0 %v1301_v42  ;;  %709 = vmatpush1.bf16.msra.mxu1 %v1378_v60  ;;  %v1433_v42 = vld [vmem:[#allocation7 + $0x60] ss:$8 sps:$4 sm:$0xff]   ;;  %v1450_v60 = vld [vmem:[#allocation7 + $0xb4] ss:$8 sps:$4 sm:$0xff]  }
  0x6b   :  { %710 = vmatprep.subr.bf16.mxu1 %v1382_v61  ;;  %v1448_v61 = vld [vmem:[#allocation7 + $0xb0] ss:$8 sps:$4 sm:$0xff]  }
  0x6d   :  { %756 = vmatpush1.bf16.msra.mxu0 %v1303_v45  ;;  %v1391_v45 = vld [vmem:[#allocation5 + $0x2c0] ss:$8 sps:$4 sm:$0xff]  }
  0x6e   :  { %757 = vmatprep.subr.bf16.mxu0 %v1304_v46  ;;  %711 = vmatpush1.bf16.msra.mxu1 %v1384_v1  ;;  %v1436_v46 = vld [vmem:[#allocation7 + $0x70] ss:$8 sps:$4 sm:$0xff]  }
  0x6f   :  { %712 = vmatprep.subr.bf16.mxu1 %v1388_v3  ;;  %v1454_v1 = vld [vmem:[#allocation7 + $0xd0] ss:$8 sps:$4 sm:$0xff]   ;;  %v1457_v3 = vld [vmem:[#allocation7 + $0xe0] ss:$8 sps:$4 sm:$0xff]  }
  0x71   :  { %758 = vmatpush1.bf16.msra.mxu0 %v1306_v49  ;;  %v1397_v49 = vld [vmem:[#allocation5 + $0x2d0] ss:$8 sps:$4 sm:$0xff]  }
  0x72   :  { %759 = vmatprep.subr.bf16.mxu0 %v1310_v50  ;;  %713 = vmatpush1.bf16.msra.mxu1 %v1390_v6  ;;  %v1439_v50 = vld [vmem:[#allocation7 + $0x80] ss:$8 sps:$4 sm:$0xff]  }
  0x73   :  { %714 = vmatprep.subr.bf16.mxu1 %v1394_v7 }
  0x75   :  { %760 = vmatpush1.bf16.msra.mxu0 %v1312_v53  ;;  %v1411_v53 = vld [vmem:[#allocation5 + $0x2f4] ss:$8 sps:$4 sm:$0xff]  }
  0x76   :  { %772 = vmatprep.subr.bf16.mxu0 %v1321_v54  ;;  %715 = vmatpush1.bf16.msra.mxu1 %v1396_v10  ;;  %v1409_v54 = vld [vmem:[#allocation5 + $0x2f0] ss:$8 sps:$4 sm:$0xff]   ;;  %v166_v10 = vlaneseq }
  0x77   :  { %716 = vmatprep.subr.bf16.mxu1 %v1400_v11 }
  0x78   :  { %762 = vmatmul.mubr.bf16.vlgmr.msra.gmra.mrb[0].mxu0 %v1316_v57  ;;  %v1444_v57 = vld [vmem:[#allocation7 + $0x94] ss:$8 sps:$4 sm:$0xff]   ;;  %v167_v11 = vshrl.u32 %v166_v10, 7 }
  0x79   :  { %773 = vmatpush1.bf16.msra.mxu0 %v1319_v58  ;;  %804 = vmatprep.mubr.bf16.mxu0 %v1414_v2  ;;  %v1447_v58 = vld [vmem:[#allocation7 + $0xa4] ss:$8 sps:$4 sm:$0xff]  }
  0x7a   :  { %774 = vmatprep.subr.bf16.mxu0 %v1327_v59  ;;  %717 = vmatpush1.bf16.msra.mxu1 %v1402_v14  ;;  %v1445_v59 = vld [vmem:[#allocation7 + $0xa0] ss:$8 sps:$4 sm:$0xff]   ;;  %v1459_v2 = vld [vmem:[#allocation7 + $0xe4] ss:$8 sps:$4 sm:$0xff]   ;;  %v172_v14 = vsub.s32 1, %v167_v11 }
  0x7b   :  { %1041 = vmatprep.subr.bf16.mxu1 %v1417_v16 }
  0x7d   :  { %775 = vmatpush1.bf16.msra.mxu0 %v1325_v63  ;;  %719 = vmatmul.mubr.bf16.vlgmr.msra.gmra.mrb[0].mxu1 %v1406_v15  ;;  %v1451_v63 = vld [vmem:[#allocation7 + $0xc0] ss:$8 sps:$4 sm:$0xff]  }
  0x7e   :  { %776 = vmatprep.subr.bf16.mxu0 %v1333_v0  ;;  %1042 = vmatpush1.bf16.msra.mxu1 %v1415_v18  ;;  %v1456_v0 = vld [vmem:[#allocation7 + $0xd4] ss:$8 sps:$4 sm:$0xff]  }
  0x7f   :  { %1043 = vmatprep.subr.bf16.mxu1 %v1420_v20 }
  0x81   :  { %777 = vmatpush1.bf16.msra.mxu0 %v1331_v4  ;;  %v1462_v4 = vld [vmem:[#allocation7 + $0xf4] ss:$8 sps:$4 sm:$0xff]  }
  0x82   :  { %778 = vmatprep.subr.bf16.mxu0 %v1339_v5  ;;  %1044 = vmatpush1.bf16.msra.mxu1 %v1418_v22  ;;  %v1460_v5 = vld [vmem:[#allocation7 + $0xf0] ss:$8 sps:$4 sm:$0xff]  }
  0x83   :  { %1045 = vmatprep.subr.bf16.mxu1 %v1423_v24 }
  0x85   :  { %779 = vmatpush1.bf16.msra.mxu0 %v1337_v8 }
  0x86   :  { %780 = vmatprep.subr.bf16.mxu0 %v1345_v9  ;;  %1046 = vmatpush1.bf16.msra.mxu1 %v1421_v26 }
  0x87   :  { %1047 = vmatprep.subr.bf16.mxu1 %v1426_v28 }
  0x89   :  { %781 = vmatpush1.bf16.msra.mxu0 %v1343_v12  ;;  %v168_v12 = vsub.s32 0, %v167_v11 }
  0x8a   :  { %782 = vmatprep.subr.bf16.mxu0 %v1351_v13  ;;  %1048 = vmatpush1.bf16.msra.mxu1 %v1424_v30  ;;  %v164_v13 = vld [vmem:[%s1667_s2] sm:$0x3] }
  0x8b   :  { %1049 = vmatprep.subr.bf16.mxu1 %v1429_v32  ;;  %v169_v15 = vrot.slane %v164_v13, %v168_v12  ;;  %v173_v16 = vrot.slane %v164_v13, %v172_v14 }
  0x8d   :  { %783 = vmatpush1.bf16.msra.mxu0 %v1349_v17 }
  0x8e   :  { %784 = vmatprep.subr.bf16.mxu0 %v1357_v19  ;;  %1050 = vmatpush1.bf16.msra.mxu1 %v1427_v34 }
  0x8f   :  { %1051 = vmatprep.subr.bf16.mxu1 %v1432_v36 }
  0x91   :  { %785 = vmatpush1.bf16.msra.mxu0 %v1355_v21 }
  0x92   :  { %786 = vmatprep.subr.bf16.mxu0 %v1363_v23  ;;  %1052 = vmatpush1.bf16.msra.mxu1 %v1430_v38 }
  0x93   :  { %1053 = vmatprep.subr.bf16.mxu1 %v1435_v40 }
  0x95   :  { %787 = vmatpush1.bf16.msra.mxu0 %v1361_v25 }
  0x96   :  { %788 = vmatprep.subr.bf16.mxu0 %v1369_v27  ;;  %1054 = vmatpush1.bf16.msra.mxu1 %v1433_v42 }
  0x97   :  { %1055 = vmatprep.subr.bf16.mxu1 %v1438_v44 }
  0x99   :  { %789 = vmatpush1.bf16.msra.mxu0 %v1367_v29 }
  0x9a   :  { %790 = vmatprep.subr.bf16.mxu0 %v1375_v31  ;;  %1056 = vmatpush1.bf16.msra.mxu1 %v1436_v46 }
  0x9b   :  { %1057 = vmatprep.subr.bf16.mxu1 %v1441_v48 }
  0x9d   :  { %791 = vmatpush1.bf16.msra.mxu0 %v1373_v33 }
  0x9e   :  { %792 = vmatprep.subr.bf16.mxu0 %v1381_v35  ;;  %1058 = vmatpush1.bf16.msra.mxu1 %v1439_v50 }
  0x9f   :  { %1059 = vmatprep.subr.bf16.mxu1 %v1444_v57 }
  0xa1   :  { %793 = vmatpush1.bf16.msra.mxu0 %v1379_v37 }
  0xa2   :  { %794 = vmatprep.subr.bf16.mxu0 %v1387_v39  ;;  %1060 = vmatpush1.bf16.msra.mxu1 %v1442_v56 }
  0xa3   :  { %1061 = vmatprep.subr.bf16.mxu1 %v1447_v58 }
  0xa5   :  { %795 = vmatpush1.bf16.msra.mxu0 %v1385_v41 }
  0xa6   :  { %796 = vmatprep.subr.bf16.mxu0 %v1393_v43  ;;  %1062 = vmatpush1.bf16.msra.mxu1 %v1445_v59 }
  0xa7   :  { %1063 = vmatprep.subr.bf16.mxu1 %v1450_v60 }
  0xa9   :  { %797 = vmatpush1.bf16.msra.mxu0 %v1391_v45 }
  0xaa   :  { %798 = vmatprep.subr.bf16.mxu0 %v1399_v47  ;;  %1064 = vmatpush1.bf16.msra.mxu1 %v1448_v61 }
  0xab   :  { %1065 = vmatprep.subr.bf16.mxu1 %v1453_v62 }
  0xad   :  { %799 = vmatpush1.bf16.msra.mxu0 %v1397_v49 }
  0xae   :  { %800 = vmatprep.subr.bf16.mxu0 %v1405_v51  ;;  %1066 = vmatpush1.bf16.msra.mxu1 %v1451_v63  ;;  %v869_v51 = vld [vmem:[%s1669_s4] sm:$0x3] }
  0xaf   :  { %1067 = vmatprep.subr.bf16.mxu1 %v1456_v0 }
  0xb1   :  { %801 = vmatpush1.bf16.msra.mxu0 %v1403_v52  ;;  %v874_v52 = vrot.slane %v869_v51, %v168_v12 }
  0xb2   :  { %802 = vmatprep.subr.bf16.mxu0 %v1411_v53  ;;  %1068 = vmatpush1.bf16.msra.mxu1 %v1454_v1  ;;  %v878_v53 = vrot.slane %v869_v51, %v172_v14 }
  0xb3   :  { %1069 = vmatprep.subr.bf16.mxu1 %v1459_v2 }
  0xb5   :  { %803 = vmatpush1.bf16.msra.mxu0 %v1409_v54 }
  0xb6   :  { %1070 = vmatpush1.bf16.msra.mxu1 %v1457_v3 }
  0xb7   :  { %1071 = vmatprep.subr.bf16.mxu1 %v1462_v4 }
  0xb8   :  { %805 = vmatmul.mubr.bf16.vlgmr.msra.gmra.mrb[0].mxu0 %v1412_v55 }
  0xba   :  { %1072 = vmatpush1.bf16.msra.mxu1 %v1460_v5 }
 0x150   :  { %v720_v6 = vpop.f32.mrb[0].mxu1 }
 0x151   :  { %v722_v7 = vpop.f32.mrb[1].mxu1  ;;  %v721_v17 = vadd.f32 %v720_v6, %v169_v15 }
 0x152   :  { %v724_v8 = vpop.f32.mrb[2].mxu1  ;;  %v723_v18 = vadd.f32 %v722_v7, %v173_v16 }
 0x153   :  { %v726_v9 = vpop.f32.mrb[3].mxu1  ;;  %v725_v20 = vadd.f32 %v724_v8, %v169_v15 }
 0x154   :  { %v727_v23 = vadd.f32 %v726_v9, %v173_v16 }
 0x18b   :  { %v806_v19 = vpop.f32.mrb[0].mxu0 }
 0x18c   :  { %v1241_v21 = vadd.f32 %v806_v19, %v721_v17  ;;  %v808_v22 = vpop.f32.mrb[1].mxu0 }
 0x18d   :  { %v1243_v24 = vadd.f32 %v808_v22, %v723_v18  ;;  %v810_v25 = vpop.f32.mrb[2].mxu0 }
 0x18e   :  { %v819_v26 = vmul.f32 0.70710677, %v1241_v21  ;;  %v1245_v27 = vadd.f32 %v810_v25, %v725_v20  ;;  %v812_v28 = vpop.f32.mrb[3].mxu0  ;;  %v815_v39 = vmul.f32 0.5, %v1241_v21 }
 0x18f   :  { %v820_v29 = vmul.f32 0.70710677, %v1243_v24  ;;  %v1247_v30 = vadd.f32 %v812_v28, %v727_v23  ;;  %v816_v42 = vmul.f32 0.5, %v1243_v24 }
 0x190   :  { %1463 = verf.f32 %v819_v26  ;;  %v821_v31 = vmul.f32 0.70710677, %v1245_v27  ;;  %v817_v40 = vmul.f32 0.5, %v1245_v27 }
 0x191   :  { %1465 = verf.f32 %v820_v29  ;;  %v822_v32 = vmul.f32 0.70710677, %v1247_v30  ;;  %v818_v43 = vmul.f32 0.5, %v1247_v30 }
 0x192   :  { %1467 = verf.f32 %v821_v31 }
 0x193   :  { %1469 = verf.f32 %v822_v32 }
 0x19a   :  { %v1464_v33 = vpop.eup %1463 }
 0x19b   :  { %v1466_v34 = vpop.eup %1465  ;;  %v827_v35 = vadd.f32 1.0, %v1464_v33 }
 0x19c   :  { %v1468_v36 = vpop.eup %1467  ;;  %v828_v37 = vadd.f32 1.0, %v1466_v34 }
 0x19d   :  { %v1470_v38 = vpop.eup %1469  ;;  %v829_v41 = vadd.f32 1.0, %v1468_v36  ;;  %v831_v45 = vmul.f32 %v827_v35, %v815_v39 }
 0x19e   :  { %v830_v44 = vadd.f32 1.0, %v1470_v38  ;;  %v832_v47 = vmul.f32 %v828_v37, %v816_v42 }
 0x19f   :  { %v833_v46 = vmul.f32 %v829_v41, %v817_v40 }
 0x1a0   :  { %v834_v48 = vmul.f32 %v830_v44, %v818_v43 }
 0x1a1   :  { %v835_v49 = vpack.c.bf16 %v833_v46, %v831_v45 }
 0x1a2   :  { %v836_v50 = vpack.c.bf16 %v834_v48, %v832_v47 }
 0x1a4   :  { %1073 = vmatprep.mubr.bf16.mxu1 %v836_v50 }
 0x1a5   :  { %1074 = vmatmul.mubr.bf16.vlgmr.msra.gmra.mrb[4].mxu1 %v835_v49 }
 0x278   :  { %v1075_v54 = vpop.f32.mrb[4].mxu1 }
 0x279   :  { %v1076_v55 = vadd.f32 %v1075_v54, %v874_v52  ;;  %v1077_v56 = vpop.f32.mrb[5].mxu1 }
 0x27a   :  { %v1078_v57 = vadd.f32 %v1077_v56, %v878_v53  ;;  %v1079_v58 = vpop.f32.mrb[6].mxu1 }
 0x27b   :  { %1084 = vst [vmem:[#allocation8] sm:$0xff] %v1076_v55  ;;  %v1080_v59 = vadd.f32 %v1079_v58, %v874_v52  ;;  %v1081_v60 = vpop.f32.mrb[7].mxu1 }
 0x27c   :  { %1085 = vst [vmem:[#allocation8 + $0x8] sm:$0xff] %v1078_v57  ;;  %v1082_v61 = vadd.f32 %v1081_v60, %v878_v53 }
 0x27d   :  { %1086 = vst [vmem:[#allocation8 + $0x10] sm:$0xff] %v1080_v59 }
 0x27e   :  { %1087 = vst [vmem:[#allocation8 + $0x18] sm:$0xff] %v1082_v61 }
 0x27f   :  { %1548 = shalt.err (!%p1545_p0)
}
 0x280   :  { %s1549_s12 = scalar_lea.hbm %s1670_s5, 512 }
 0x281   :  { %p1550_p1 = scmp.ne.s32.totalorder %s1670_s5, %s1549_s12  ;;  %p1553_p2 = scmp.lt.u32.totalorder %s1549_s12, %s1670_s5 }
 0x283   :  { %p1555_p3 = pnand %p1553_p2, %p1550_p1 }
 0x285   :  { %1558 = shalt.err (!%p1555_p3)
}
 0x286   :  { %s1573_s1 = smov 256   ;;  %s1574_s17 = smov 16  }
 0x287   :  { %1099 = dma.vmem_to_hbm [thread:$0]  %s1094_s9, 512, %s1670_s5, [#allocation4], %s1573_s1, %s1573_s1, %s1574_s17  }
 0x288   :  { %1563 = dma.done.wait [#allocation4], 512  }
 0x289   :  { %1564 = vsyncadd [#allocation4], 4294966784 }
 0x28a   :  { %1103 = vsyncpa [#allocation3], 1 }
 0x28b   :  { %1104 = vsyncpa [#allocation6], 1 }
 0x28c   :  { %1105 = vsyncpa [#allocation4], 1 }

</bundles_post_ra>
